<compile_context>
chip_gen: v5e
topology: v5e:2x2
jax: 0.10.0
libtpu: 0.0.40
codegen_flags: <defaults>
</compile_context>

<pallas_src>
import jax
import jax.numpy as jnp
from jax.experimental import pallas as pl
from jax.experimental.pallas import tpu as pltpu

_LANE = 128


def _identity_kernel(x_ref, o_ref):
    o_ref[...] = x_ref[...]


def _sublane_multiple(dtype) -> int:
    """Packed-sublane tile height: 8 for 4-byte, 16 for 2-byte, 32 for 1-byte."""
    itemsize = jnp.dtype(dtype).itemsize
    if itemsize >= 4:
        return 8
    if itemsize == 2:
        return 16
    return 32


def _copy_2d(x2d, tile_rows):
    rows, cols = x2d.shape
    grid = (pl.cdiv(rows, tile_rows),)
    return pl.pallas_call(
        _identity_kernel,
        out_shape=jax.ShapeDtypeStruct((rows, cols), x2d.dtype),
        grid_spec=pltpu.PrefetchScalarGridSpec(
            num_scalar_prefetch=0,
            grid=grid,
            in_specs=[pl.BlockSpec((tile_rows, cols), lambda i: (i, 0))],
            out_specs=pl.BlockSpec((tile_rows, cols), lambda i: (i, 0)),
        ),
        compiler_params=pltpu.CompilerParams(
            dimension_semantics=("parallel",)),  # lets v7x shard blocks across both TCs
        # Alias input buffer to output: identity needs no new HBM allocation /
        # no extra read+write traffic when the buffer can be donated.
        input_output_aliases={0: 0},
    )(x2d)


@jax.jit
def identity_pallas(x):
    """Identity forward pass of module F as a Pallas TPU kernel."""
    orig_shape = x.shape
    dtype = x.dtype
    n = x.size
    if n == 0:
        return x

    sub = _sublane_multiple(dtype)          # dtype-aware sublane multiple
    itemsize = jnp.dtype(dtype).itemsize

    flat = x.reshape(-1)

    # Pad-free path whenever the element count is a multiple of the minimum
    # tile (sub * 128); padding/slicing is only a rare fallback.
    pad = 0
    if n % (sub * _LANE) != 0:
        padded_n = pl.cdiv(n, sub * _LANE) * sub * _LANE
        pad = padded_n - n
        flat = jnp.pad(flat, (0, pad))
    total = n + pad

    # Widest lane-dense column count (multiple of 128, <= 2048) that divides
    # `total` with the row count still a multiple of the sublane tile.
    cols = _LANE
    c = min(2048, total // sub)
    c = (c // _LANE) * _LANE
    while c >= _LANE:
        if total % c == 0 and (total // c) % sub == 0:
            cols = c
            break
        c -= _LANE

    rows = total // cols
    x2d = flat.reshape(rows, cols)

    # ~2 MiB blocks: (in + out) x double-buffering ~= 8 MiB of VMEM, which fits
    # the default scoped VMEM on v5e (16 MiB), v6e (32 MiB) and v7x (32 of 64 MiB),
    # while being large enough to run near the HBM roofline.
    target_block_bytes = 2 * 1024 * 1024
    tile_rows = max(sub, (target_block_bytes // (cols * itemsize)) // sub * sub)
    tile_rows = min(tile_rows, rows)

    out2d = _copy_2d(x2d, tile_rows)

    out = out2d.reshape(-1)
    if pad:
        out = out[:n]
    return out.reshape(orig_shape)


if __name__ == "__main__":
    key = jax.random.PRNGKey(0)
    x = jax.random.normal(key, (2, 4, 16, 16), dtype=jnp.float32)  # NCHW
    y = identity_pallas(x)
    jax.block_until_ready(y)
    assert y.shape == x.shape and y.dtype == x.dtype
    assert bool(jnp.all(y == x))
    print("KERNEL_OK")
</pallas_src>

<mosaic_0001>
module attributes {stable_mosaic.version = 11 : i64} {
  func.func @_identity_kernel(%arg0: i32, %arg1: memref<8x256xf32, #tpu.memory_space<vmem>>, %arg2: memref<8x256xf32, #tpu.memory_space<vmem>>) attributes {dimension_semantics = [#tpu.dimension_semantics<parallel>], iteration_bounds = array<i64: 1>, scalar_prefetch = 0 : i64, scratch_operands = 0 : i64, tpu.core_type = #tpu.core_type<tc>, window_params = [{transform_indices = @transform_0, window_bounds = array<i64: 8, 256>}, {transform_indices = @transform_1, window_bounds = array<i64: 8, 256>}]} {
    %c0 = arith.constant 0 : index
    %c0_0 = arith.constant 0 : index
    %0 = vector.load %arg1[%c0, %c0_0] : memref<8x256xf32, #tpu.memory_space<vmem>>, vector<8x256xf32>
    %c0_1 = arith.constant 0 : index
    %c0_2 = arith.constant 0 : index
    %1 = vector.load %arg2[%c0_1, %c0_2] : memref<8x256xf32, #tpu.memory_space<vmem>>, vector<8x256xf32>
    tpu.vector_store %arg2[%c0_1, %c0_2], %0 {strides = array<i32>} : memref<8x256xf32, #tpu.memory_space<vmem>>, vector<8x256xf32>,
    return
  }
  func.func @transform_0(%arg0: i32) -> (i32, i32) {
    %c0_i32 = arith.constant 0 : i32
    %c0_i32_0 = arith.constant 0 : i32
    return %arg0, %c0_i32 : i32, i32
  }
  func.func @transform_1(%arg0: i32) -> (i32, i32) {
    %c0_i32 = arith.constant 0 : i32
    %c0_i32_0 = arith.constant 0 : i32
    return %arg0, %c0_i32 : i32, i32
  }
}

</mosaic_0001>

<bundles_post_ra>
// kernel: identity_pallas.1
= control target key start
LH: loop header
LB: loop body
LE: loop exit
PB: predicated region body
PF: predicated region fallthrough
CT: control target
= control target key end

     0   :  { %s38_s0 = inlined_call_operand.vmem [shape: f32[8,256], index: 0, kind: input, shape index: {}, may-alias: {0,1}]   ;;  %s39_s1 = inlined_call_operand.vmem [shape: f32[8,256], index: 1, kind: output, shape index: {}, may-alias: {0,1}]  }
   0x1   :  { %v8_v0 = vld [vmem:[%s38_s0] sm:$0xff]  ;;  %v9_v1 = vld [vmem:[%s38_s0 + $0x8] sm:$0xff] }
   0x2   :  { %10 = vst [vmem:[%s39_s1] sm:$0xff] %v8_v0 }
   0x3   :  { %11 = vst [vmem:[%s39_s1 + $0x8] sm:$0xff] %v9_v1 }

</bundles_post_ra>
